<compile_context>
chip_gen: v7x
topology: tpu7x:2x2x1
jax: 0.10.0
libtpu: 0.0.40
codegen_flags: <defaults>
</compile_context>

<pallas_src>
import functools

import jax
import jax.numpy as jnp
from jax import lax
from jax.experimental import pallas as pl
from jax.experimental.pallas import tpu as pltpu

DROPOUT_P = 0.1

# ~2 MiB per f32 block per array (1 MiB for bf16).  With 3 arrays x 2 pipeline
# buffers that is ~12 MiB of block buffers plus kernel temporaries.
_TARGET_BLOCK_ELEMS = 512 * 1024
# Headroom for block buffers + elementwise temporaries; < 64 MiB (v7x physical
# per-TC VMEM) and far below v5e/v6e's 128 MiB physical.
_VMEM_LIMIT_BYTES = 48 * 1024 * 1024


def _round_up(x, m):
    return (x + m - 1) // m * m


def _hash_u32(x):
    # lowbias32 finalizer: strong avalanche, only xor/shift/mul (VPU slots).
    x = x ^ (x >> 16)
    x = x * jnp.uint32(0x7FEB352D)
    x = x ^ (x >> 15)
    x = x * jnp.uint32(0x846CA68B)
    x = x ^ (x >> 16)
    return x


def _dropout_pn_kernel(seed_ref, x_ref, zi_ref, zj_ref, *, p, tm, lanes):
    # Drop iff bits16 < round(p * 2^16)  =>  keep probability 1 - p
    # (quantized to 1/65536, negligible for dropout rates).
    thresh16 = jnp.uint32(int(round(p * 65536.0)))

    # Global element index (unique regardless of tiling), salted with the seed.
    # int32 math wraps for tensors >= 2^31 elements; still a valid hash key
    # mod 2^32 (uniqueness holds for n < 2^32).
    row0 = pl.program_id(0) * tm
    rows_i = lax.broadcasted_iota(jnp.int32, (tm, lanes), 0)
    cols_i = lax.broadcasted_iota(jnp.int32, (tm, lanes), 1)
    idx = (row0 + rows_i) * lanes + cols_i            # lanes is a power of 2 -> shift
    k = (idx + seed_ref[0] * jnp.int32(0x6A09E667)).astype(jnp.uint32)

    # ONE hash per element; low/high 16 bits give two decorrelated Bernoulli draws.
    bits = _hash_u32(k)
    keep_i = (bits & jnp.uint32(0xFFFF)) >= thresh16
    keep_j = (bits >> 16) >= thresh16

    x = x_ref[...]
    xs = x * jnp.asarray(1.0 / (1.0 - p), dtype=x.dtype)   # hoisted survivor scale
    zero = jnp.zeros((), dtype=x.dtype)
    zi_ref[...] = jnp.where(keep_i, xs, zero)
    zj_ref[...] = jnp.where(keep_j, xs, zero)


def bernoulli_dropout_noise_pn_generator(emb, seed, *, p=DROPOUT_P):
    """Returns (z_i, z_j): two independently-dropped-out copies of emb."""
    assert 0.0 <= p < 1.0, p
    orig_shape = emb.shape
    n = int(emb.size)
    flat = emb.reshape(-1)

    # Lane width: largest 128-multiple power-of-two divisor of n -> reshape is a
    # free bitcast, no pad, no output slice.  Ragged n (rare) pads to 128.
    lanes = None
    for cand in (1024, 512, 256, 128):
        if n % cand == 0:
            lanes = cand
            break
    padded = False
    if lanes is None:
        lanes = 128
        rows = -(-n // lanes)
        flat = jnp.pad(flat, (0, rows * lanes - n))
        padded = True
    rows = flat.shape[0] // lanes
    x2d = flat.reshape(rows, lanes)

    # Row-block size: ~_TARGET_BLOCK_ELEMS per block, multiple of 8 sublanes,
    # and >= 2 grid steps when possible so both v7x TensorCores get work.
    # Partial boundary blocks (rows % tm != 0) are handled by Pallas.
    if rows <= 8:
        tm = rows                      # single block; equals full dim -> allowed
    else:
        tm_cap = max(8, (_TARGET_BLOCK_ELEMS // lanes) // 8 * 8)
        half = _round_up(-(-rows // 2), 8)
        tm = max(8, min(tm_cap, half))
    grid_rows = -(-rows // tm)

    seed_arr = jnp.asarray([seed], dtype=jnp.int32)
    kernel = functools.partial(_dropout_pn_kernel, p=float(p), tm=tm, lanes=lanes)

    zi2d, zj2d = pl.pallas_call(
        kernel,
        out_shape=(
            jax.ShapeDtypeStruct((rows, lanes), emb.dtype),
            jax.ShapeDtypeStruct((rows, lanes), emb.dtype),
        ),
        grid_spec=pltpu.PrefetchScalarGridSpec(
            num_scalar_prefetch=1,
            grid=(grid_rows,),
            in_specs=[
                pl.BlockSpec((tm, lanes), lambda i, seed_ref: (i, 0)),
            ],
            out_specs=[
                pl.BlockSpec((tm, lanes), lambda i, seed_ref: (i, 0)),
                pl.BlockSpec((tm, lanes), lambda i, seed_ref: (i, 0)),
            ],
        ),
        compiler_params=pltpu.CompilerParams(
            dimension_semantics=("parallel",),       # independent tiles -> megacore
            vmem_limit_bytes=_VMEM_LIMIT_BYTES,
        ),
    )(seed_arr, x2d)

    if padded:
        z_i = zi2d.reshape(-1)[:n].reshape(orig_shape)
        z_j = zj2d.reshape(-1)[:n].reshape(orig_shape)
    else:
        z_i = zi2d.reshape(orig_shape)
        z_j = zj2d.reshape(orig_shape)
    return z_i, z_j


if __name__ == "__main__":
    key = jax.random.PRNGKey(0)
    k1, k2, k3 = jax.random.split(key, 3)
    scale = 1.0 / (1.0 - DROPOUT_P)

    def check(emb, seed, check_stats=True):
        z_i, z_j = bernoulli_dropout_noise_pn_generator(emb, seed, p=DROPOUT_P)
        jax.block_until_ready((z_i, z_j))
        assert z_i.shape == emb.shape and z_j.shape == emb.shape
        assert z_i.dtype == emb.dtype and z_j.dtype == emb.dtype
        ref = emb * scale
        for z in (z_i, z_j):
            kept = z != 0
            # Survivors are exactly the scaled input; dropped entries are zero.
            assert jnp.allclose(jnp.where(kept, z, ref), ref, rtol=1e-5, atol=1e-6)
            if check_stats:
                drop_frac = 1.0 - float(jnp.mean(kept.astype(jnp.float32)))
                assert 0.01 < drop_frac < 0.3, drop_frac   # roughly p = 0.1
        # The two masks are independent draws (almost surely differ somewhere).
        assert bool(jnp.any((z_i == 0) != (z_j == 0)))

    # Primary: embedding-like (batch=2, seq=8, hidden=32) -> zero-copy, 1 block.
    emb = jax.random.normal(k1, (2, 8, 32), dtype=jnp.float32)
    check(emb, seed=0)

    # Multi-block path with a partial boundary block (rows=24, tm=16, grid=2).
    emb2 = jax.random.normal(k2, (4, 96, 64), dtype=jnp.float32)
    check(emb2, seed=1)

    # Ragged fallback path (n not a multiple of 128) -> small pad + slice.
    emb3 = jax.random.normal(k3, (3, 7, 5), dtype=jnp.float32)
    check(emb3, seed=2, check_stats=False)

    print("KERNEL_OK")
</pallas_src>

<mosaic_0001>
module attributes {stable_mosaic.version = 11 : i64} {
  func.func @_dropout_pn_kernel(%arg0: i32, %arg1: memref<1xi32, #tpu.memory_space<smem>>, %arg2: memref<1x512xf32, #tpu.memory_space<vmem>>, %arg3: memref<1x512xf32, #tpu.memory_space<vmem>>, %arg4: memref<1x512xf32, #tpu.memory_space<vmem>>) attributes {dimension_semantics = [#tpu.dimension_semantics<parallel>], iteration_bounds = array<i64: 1>, scalar_prefetch = 1 : i64, scratch_operands = 0 : i64, tpu.core_type = #tpu.core_type<tc>, window_params = [{transform_indices = @transform_0, window_bounds = array<i64: 1, 512>}, {transform_indices = @transform_1, window_bounds = array<i64: 1, 512>}, {transform_indices = @transform_2, window_bounds = array<i64: 1, 512>}]} {
    %c1_i32 = arith.constant 1 : i32
    %0 = arith.muli %arg0, %c1_i32 : i32
    %1 = tpu.iota {dimensions = array<i32: 0>} : vector<1x512xi32>
    %2 = tpu.iota {dimensions = array<i32: 1>} : vector<1x512xi32>
    %3 = vector.broadcast %0 : i32 to vector<1x512xi32>
    %4 = arith.addi %3, %1 : vector<1x512xi32>
    %c512_i32 = arith.constant 512 : i32
    %5 = vector.broadcast %c512_i32 : i32 to vector<1x512xi32>
    %6 = arith.muli %4, %5 : vector<1x512xi32>
    %7 = arith.addi %6, %2 : vector<1x512xi32>
    %c0 = arith.constant 0 : index
    %8 = memref.load %arg1[%c0] : memref<1xi32, #tpu.memory_space<smem>>
    %c1779033703_i32 = arith.constant 1779033703 : i32
    %9 = arith.muli %8, %c1779033703_i32 : i32
    %10 = vector.broadcast %9 : i32 to vector<1x512xi32>
    %11 = arith.addi %7, %10 : vector<1x512xi32>
    %c16_i32 = arith.constant 16 : i32
    %12 = vector.broadcast %c16_i32 : i32 to vector<1x512xi32>
    %13 = arith.shrui %11, %12 : vector<1x512xi32>
    %14 = arith.xori %11, %13 : vector<1x512xi32>
    %c2146121005_i32 = arith.constant 2146121005 : i32
    %15 = vector.broadcast %c2146121005_i32 : i32 to vector<1x512xi32>
    %16 = arith.muli %14, %15 : vector<1x512xi32>
    %c15_i32 = arith.constant 15 : i32
    %17 = vector.broadcast %c15_i32 : i32 to vector<1x512xi32>
    %18 = arith.shrui %16, %17 : vector<1x512xi32>
    %19 = arith.xori %16, %18 : vector<1x512xi32>
    %c-2073254261_i32 = arith.constant -2073254261 : i32
    %20 = vector.broadcast %c-2073254261_i32 : i32 to vector<1x512xi32>
    %21 = arith.muli %19, %20 : vector<1x512xi32>
    %c16_i32_0 = arith.constant 16 : i32
    %22 = vector.broadcast %c16_i32_0 : i32 to vector<1x512xi32>
    %23 = arith.shrui %21, %22 : vector<1x512xi32>
    %24 = arith.xori %21, %23 : vector<1x512xi32>
    %c65535_i32 = arith.constant 65535 : i32
    %25 = vector.broadcast %c65535_i32 : i32 to vector<1x512xi32>
    %26 = arith.andi %24, %25 : vector<1x512xi32>
    %c6554_i32 = arith.constant 6554 : i32
    %27 = vector.broadcast %c6554_i32 : i32 to vector<1x512xi32>
    %28 = arith.cmpi uge, %26, %27 : vector<1x512xi32>
    %c16_i32_1 = arith.constant 16 : i32
    %29 = vector.broadcast %c16_i32_1 : i32 to vector<1x512xi32>
    %30 = arith.shrui %24, %29 : vector<1x512xi32>
    %c6554_i32_2 = arith.constant 6554 : i32
    %31 = vector.broadcast %c6554_i32_2 : i32 to vector<1x512xi32>
    %32 = arith.cmpi uge, %30, %31 : vector<1x512xi32>
    %c0_3 = arith.constant 0 : index
    %c0_4 = arith.constant 0 : index
    %33 = vector.load %arg2[%c0_3, %c0_4] : memref<1x512xf32, #tpu.memory_space<vmem>>, vector<1x512xf32>
    %cst = arith.constant 1.11111116 : f32
    %34 = vector.broadcast %cst : f32 to vector<1x512xf32>
    %35 = arith.mulf %33, %34 : vector<1x512xf32>
    %cst_5 = arith.constant 0.000000e+00 : f32
    %36 = vector.broadcast %cst_5 : f32 to vector<1x512xf32>
    %37 = arith.select %28, %35, %36 : vector<1x512xi1>, vector<1x512xf32>
    %c0_6 = arith.constant 0 : index
    %c0_7 = arith.constant 0 : index
    %38 = vector.load %arg3[%c0_6, %c0_7] : memref<1x512xf32, #tpu.memory_space<vmem>>, vector<1x512xf32>
    tpu.vector_store %arg3[%c0_6, %c0_7], %37 {strides = array<i32>} : memref<1x512xf32, #tpu.memory_space<vmem>>, vector<1x512xf32>,
    %cst_8 = arith.constant 0.000000e+00 : f32
    %39 = vector.broadcast %cst_8 : f32 to vector<1x512xf32>
    %40 = arith.select %32, %35, %39 : vector<1x512xi1>, vector<1x512xf32>
    %c0_9 = arith.constant 0 : index
    %c0_10 = arith.constant 0 : index
    %41 = vector.load %arg4[%c0_9, %c0_10] : memref<1x512xf32, #tpu.memory_space<vmem>>, vector<1x512xf32>
    tpu.vector_store %arg4[%c0_9, %c0_10], %40 {strides = array<i32>} : memref<1x512xf32, #tpu.memory_space<vmem>>, vector<1x512xf32>,
    return
  }
  func.func @transform_0(%arg0: i32, %arg1: memref<1xi32, #tpu.memory_space<smem>>) -> (i32, i32) {
    %c0_i32 = arith.constant 0 : i32
    %c0_i32_0 = arith.constant 0 : i32
    return %arg0, %c0_i32 : i32, i32
  }
  func.func @transform_1(%arg0: i32, %arg1: memref<1xi32, #tpu.memory_space<smem>>) -> (i32, i32) {
    %c0_i32 = arith.constant 0 : i32
    %c0_i32_0 = arith.constant 0 : i32
    return %arg0, %c0_i32 : i32, i32
  }
  func.func @transform_2(%arg0: i32, %arg1: memref<1xi32, #tpu.memory_space<smem>>) -> (i32, i32) {
    %c0_i32 = arith.constant 0 : i32
    %c0_i32_0 = arith.constant 0 : i32
    return %arg0, %c0_i32 : i32, i32
  }
}

</mosaic_0001>

<bundles_post_ra>
// kernel: tpu_custom_call.1
= control target key start
LH: loop header
LB: loop body
LE: loop exit
PB: predicated region body
PF: predicated region fallthrough
CT: control target
= control target key end

     0   :  { %10 = vsyncpa [#allocation5], 0  ;;  %s389_s0 = inlined_call_operand.<no memory space> [shape: s32[1], index: 0, kind: input, shape index: {}]   ;;  %s390_s1 = inlined_call_operand.hbm [shape: f32[1,512], index: 1, kind: input, shape index: {}]   ;;  %s391_s2 = inlined_call_operand.hbm [shape: f32[1,512], index: 2, kind: output, shape index: {0}]   ;;  %s392_s3 = inlined_call_operand.hbm [shape: f32[1,512], index: 3, kind: output, shape index: {1}]  }
   0x1   :  { %11 = vsyncpa [#allocation6], 0 }
   0x2   :  { %12 = vsyncpa [#allocation9], 0  ;;  %s295_s12 = smov [#allocation4]   ;;  %s223_s16 = scalar_lea.hbm %s390_s1, 64 }
   0x3   :  { %s19_s13 = sshll.u32 %s295_s12, 4  ;;  %p224_p0 = scmp.ne.s32.totalorder %s390_s1, %s223_s16  ;;  %s20_s13 = int_to_ptr.vmem [resolvable:$true] %s19_s13 }
   0x4   :  { %p227_p1 = scmp.lt.u32.totalorder %s223_s16, %s390_s1 }
   0x6   :  { %p229_p2 = pnand %p227_p1, %p224_p0 }
   0x8   :  { %232 = shalt.err (!%p229_p2)
}
   0x9   :  { %s233_s21 = scalar_lea.vmem %s20_s13, 64  ;;  %p238_p4 = scmp.lt.s32.totalorder %s20_s13, %s20_s13 }
   0xa   :  { %p234_p3 = scmp.ne.s32.totalorder %s20_s13, %s233_s21  ;;  %p239_p5 = scmp.lt.s32.totalorder %s233_s21, %s233_s21 }
   0xc   :  { %p240_p6 = por %p239_p5, %p238_p4 }
   0xe   :  { %p241_p7 = pnand %p240_p6, %p234_p3 }
  0x10   :  { %244 = shalt.err (!%p241_p7)
}
  0x11   :  { %22 = dma.hbm_to_vmem [thread:$0]  %s390_s1, 64, %s20_s13, [#allocation5]  }
  0x12   :  { %289 = dma.done.wait [#allocation5], 64  }
  0x13   :  { %290 = vsyncadd [#allocation5], 4294967232  ;;  %v26_v0 = vlaneseq  ;;  %s41_s26 = smul.u32 1779033703, %s389_s0  ;;  %v296_v26 = vmov 1966171168  }
  0x14   :  { %v129_v27 = vunpack.c.l.s4 %v296_v26  ;;  %v95_v34 = vld [vmem:[#allocation4] sm:$0xf]  ;;  %s297_s0 = smov [#allocation7]   ;;  %s298_s27 = smov [#allocation8]  }
  0x15   :  { %v27_v1 = vshrl.u32 %v26_v0, 7  ;;  %v29_v2 = vand.u32 127, %v26_v0  ;;  %v42_v7 = vstv %s41_s26  ;;  %v96_v44 = vmul.f32 1.1111112, %v95_v34  ;;  %s196_s1 = sshll.u32 %s297_s0, 4  ;;  %s206_s28 = sshll.u32 %s298_s27, 4  ;;  %s197_s1 = int_to_ptr.vmem [resolvable:$true] %s196_s1  ;;  %s207_s28 = int_to_ptr.vmem [resolvable:$true] %s206_s28 }
  0x16   :  { %v130_v37 = vunpack.c.0.s8 %v129_v27  ;;  %vm355_vm8 = vcmp.lt.s32.totalorder %v26_v0, 512  ;;  %s245_s29 = scalar_lea.vmem %s197_s1, 64  ;;  %p250_p9 = scmp.lt.s32.totalorder %s197_s1, %s197_s1 }
  0x17   :  { %v30_v3 = vadd.s32 128, %v29_v2  ;;  %v31_v4 = vadd.s32 256, %v29_v2  ;;  %v32_v5 = vadd.s32 384, %v29_v2  ;;  %v35_v6 = vmul.u32 512, %v27_v1  ;;  %p246_p8 = scmp.ne.s32.totalorder %s197_s1, %s245_s29  ;;  %p251_p10 = scmp.lt.s32.totalorder %s245_s29, %s245_s29 }
  0x18   :  { %v100_v40 = vsub.s32 0, %v27_v1  ;;  %v104_v41 = vsub.s32 1, %v27_v1  ;;  %v108_v47 = vsub.s32 2, %v27_v1  ;;  %v112_v48 = vsub.s32 3, %v27_v1 }
  0x19   :  { %v36_v8 = vadd.s32 %v35_v6, %v29_v2  ;;  %v37_v9 = vadd.s32 %v35_v6, %v30_v3  ;;  %v38_v10 = vadd.s32 %v35_v6, %v31_v4  ;;  %v39_v11 = vadd.s32 %v35_v6, %v32_v5  ;;  %p252_p11 = por %p251_p10, %p250_p9 }
  0x1a   :  { %v336_v53 = vsub.s32 %v130_v37, %v27_v1  ;;  %v101_v56 = vrot.slane %v96_v44, %v100_v40  ;;  %v105_v57 = vrot.slane %v96_v44, %v104_v41  ;;  %v109_v60 = vrot.slane %v96_v44, %v108_v47 }
  0x1b   :  { %v43_v12 = vadd.s32 %v42_v7, %v36_v8  ;;  %v44_v13 = vadd.s32 %v42_v7, %v37_v9  ;;  %v45_v14 = vadd.s32 %v42_v7, %v38_v10  ;;  %v46_v15 = vadd.s32 %v42_v7, %v39_v11  ;;  %p253_p12 = pnand %p252_p11, %p246_p8 }
  0x1c   :  { %v113_v61 = vrot.slane %v96_v44, %v112_v48 }
  0x1d   :  { %v47_v16 = vshrl.u32 %v43_v12, 16  ;;  %v48_v17 = vshrl.u32 %v44_v13, 16  ;;  %v49_v18 = vshrl.u32 %v45_v14, 16  ;;  %v50_v19 = vshrl.u32 %v46_v15, 16 }
  0x1f   :  { %v51_v20 = vxor.u32 %v47_v16, %v43_v12  ;;  %v52_v21 = vxor.u32 %v48_v17, %v44_v13  ;;  %v53_v22 = vxor.u32 %v49_v18, %v45_v14  ;;  %v54_v23 = vxor.u32 %v50_v19, %v46_v15 }
  0x21   :  { %v55_v24 = vmul.u32 2146121005, %v51_v20  ;;  %v56_v25 = vmul.u32 2146121005, %v52_v21 }
  0x22   :  { %v57_v28 = vmul.u32 2146121005, %v53_v22  ;;  %v58_v29 = vmul.u32 2146121005, %v54_v23 }
  0x23   :  { %v59_v30 = vshrl.u32 %v55_v24, 15  ;;  %v60_v31 = vshrl.u32 %v56_v25, 15 }
  0x24   :  { %v61_v32 = vshrl.u32 %v57_v28, 15  ;;  %v62_v33 = vshrl.u32 %v58_v29, 15 }
  0x25   :  { %v63_v35 = vxor.u32 %v59_v30, %v55_v24  ;;  %v64_v36 = vxor.u32 %v60_v31, %v56_v25 }
  0x26   :  { %v65_v38 = vxor.u32 %v61_v32, %v57_v28  ;;  %v66_v39 = vxor.u32 %v62_v33, %v58_v29 }
  0x27   :  { %v67_v42 = vmul.u32 2221713035, %v63_v35  ;;  %v68_v43 = vmul.u32 2221713035, %v64_v36 }
  0x28   :  { %v69_v45 = vmul.u32 2221713035, %v65_v38  ;;  %v70_v46 = vmul.u32 2221713035, %v66_v39 }
  0x29   :  { %v71_v49 = vshrl.u32 %v67_v42, 16  ;;  %v72_v50 = vshrl.u32 %v68_v43, 16 }
  0x2a   :  { %v73_v51 = vshrl.u32 %v69_v45, 16  ;;  %v74_v52 = vshrl.u32 %v70_v46, 16 }
  0x2b   :  { %v75_v54 = vxor.u32 %v71_v49, %v67_v42  ;;  %v76_v55 = vxor.u32 %v72_v50, %v68_v43 }
  0x2c   :  { %v77_v58 = vxor.u32 %v73_v51, %v69_v45  ;;  %v78_v59 = vxor.u32 %v74_v52, %v70_v46 }
  0x2d   :  { %v79_v62 = vand.u32 65535, %v75_v54  ;;  %v80_v63 = vand.u32 65535, %v76_v55  ;;  %v87_v2 = vshrl.u32 %v75_v54, 16  ;;  %v88_v3 = vshrl.u32 %v76_v55, 16 }
  0x2e   :  { %v81_v4 = vand.u32 65535, %v77_v58  ;;  %v82_v5 = vand.u32 65535, %v78_v59  ;;  %v89_v6 = vshrl.u32 %v77_v58, 16  ;;  %v90_v7 = vshrl.u32 %v78_v59, 16 }
  0x2f   :  { %vm83_vm0 = vcmp.ge.u32.totalorder %v79_v62, 6554  ;;  %vm84_vm1 = vcmp.ge.u32.totalorder %v80_v63, 6554  ;;  %vm338_vm2 = vcmp.ge.u32.totalorder %v87_v2, 6554  ;;  %vm342_vm3 = vcmp.ge.u32.totalorder %v88_v3, 6554 }
  0x30   :  { %vm85_vm4 = vcmp.ge.u32.totalorder %v81_v4, 6554  ;;  %vm86_vm5 = vcmp.ge.u32.totalorder %v82_v5, 6554  ;;  %v118_v9 = vsel %vm83_vm0, %v101_v56, 0.0  ;;  %v119_v10 = vsel %vm84_vm1, %v105_v57, 0.0 }
  0x31   :  { %v120_v11 = vsel %vm85_vm4, %v109_v60, 0.0  ;;  %v121_v12 = vsel %vm86_vm5, %v113_v61, 0.0  ;;  %v126_v13 = vcombine.low %v118_v9, %v119_v10  ;;  %vm93_vm6 = vcmp.ge.u32.totalorder %v89_v6, 6554 }
  0x32   :  { %v127_v14 = vcombine.low %v120_v11, %v121_v12  ;;  %vm94_vm7 = vcmp.ge.u32.totalorder %v90_v7, 6554  ;;  %v156_v15 = vsel %vm338_vm2, %v101_v56, 0.0  ;;  %v157_v16 = vsel %vm342_vm3, %v105_v57, 0.0 }
  0x33   :  { %v134_v17 = vrot.slane %v126_v13, %v336_v53  ;;  %v158_v18 = vsel %vm93_vm6, %v109_v60, 0.0  ;;  %v159_v19 = vsel %vm94_vm7, %v113_v61, 0.0  ;;  %v164_v20 = vcombine.low %v156_v15, %v157_v16 }
  0x34   :  { %v141_v21 = vrot.slane %v127_v14, %v336_v53  ;;  %v165_v22 = vcombine.low %v158_v18, %v159_v19 }
  0x35   :  { %v172_v23 = vrot.slane %v164_v20, %v336_v53 }
  0x36   :  { %v142_v24 = vcombine.low %v134_v17, %v141_v21  ;;  %v179_v25 = vrot.slane %v165_v22, %v336_v53 }
  0x38   :  { %v149_v27 = vrot.slane %v142_v24, %v336_v53  ;;  %v180_v28 = vcombine.low %v172_v23, %v179_v25 }
  0x3a   :  { %155 = vst.msk [vmem:[#allocation7] sm:$0xf] %vm355_vm8, %v149_v27  ;;  %v187_v29 = vrot.slane %v180_v28, %v336_v53 }
  0x3b   :  { %256 = shalt.err (!%p253_p12)
}
  0x3c   :  { %s257_s5 = scalar_lea.hbm %s391_s2, 64 }
  0x3d   :  { %p258_p13 = scmp.ne.s32.totalorder %s391_s2, %s257_s5  ;;  %p261_p0 = scmp.lt.u32.totalorder %s257_s5, %s391_s2 }
  0x3f   :  { %p263_p1 = pnand %p261_p0, %p258_p13 }
  0x41   :  { %266 = shalt.err (!%p263_p1)
}
  0x42   :  { %199 = dma.vmem_to_hbm [thread:$0]  %s197_s1, 64, %s391_s2, [#allocation6]   ;;  %189 = vst.msk [vmem:[#allocation8] sm:$0xf] %vm355_vm8, %v187_v29 }
  0x43   :  { %s267_s12 = scalar_lea.vmem %s207_s28, 64  ;;  %p272_p3 = scmp.lt.s32.totalorder %s207_s28, %s207_s28 }
  0x44   :  { %p268_p2 = scmp.ne.s32.totalorder %s207_s28, %s267_s12  ;;  %p273_p4 = scmp.lt.s32.totalorder %s267_s12, %s267_s12 }
  0x46   :  { %p274_p5 = por %p273_p4, %p272_p3 }
  0x48   :  { %p275_p6 = pnand %p274_p5, %p268_p2 }
  0x4a   :  { %278 = shalt.err (!%p275_p6)
}
  0x4b   :  { %s279_s15 = scalar_lea.hbm %s392_s3, 64 }
  0x4c   :  { %p280_p7 = scmp.ne.s32.totalorder %s392_s3, %s279_s15  ;;  %p283_p8 = scmp.lt.u32.totalorder %s279_s15, %s392_s3 }
  0x4e   :  { %p285_p9 = pnand %p283_p8, %p280_p7 }
  0x50   :  { %288 = shalt.err (!%p285_p9)
}
  0x51   :  { %209 = dma.vmem_to_hbm [thread:$0]  %s207_s28, 64, %s392_s3, [#allocation9]  }
  0x52   :  { %291 = dma.done.wait [#allocation6], 64  }
  0x53   :  { %292 = vsyncadd [#allocation6], 4294967232 }
  0x54   :  { %293 = dma.done.wait [#allocation9], 64  }
  0x55   :  { %294 = vsyncadd [#allocation9], 4294967232 }
  0x56   :  { %216 = vsyncpa [#allocation5], 1 }
  0x57   :  { %217 = vsyncpa [#allocation6], 1 }
  0x58   :  { %218 = vsyncpa [#allocation9], 1 }

</bundles_post_ra>
